<compile_context>
chip_gen: v7x
topology: tpu7x:2x2x1
jax: 0.10.0
libtpu: 0.0.40
codegen_flags: <defaults>
</compile_context>

<pallas_src>
import numpy as np
import jax
import jax.numpy as jnp
from jax.experimental import pallas as pl
from jax.experimental.pallas import tpu as pltpu


# ----------------------------- helpers ----------------------------------------

def _round_up(x, m):
    return ((x + m - 1) // m) * m


def _cdiv(a, b):
    return (a + b - 1) // b


def _pad2(a, rpad, cpad):
    if rpad == 0 and cpad == 0:
        return a
    return jnp.pad(a, ((0, rpad), (0, cpad)))


# ----------------------------- Pallas kernels ----------------------------------

def _noisy_linear_kernel(x_ref, wmu_ref, wsig_ref, eps_in_ref, eps_out_ref,
                         bias_ref, o_ref, acc_ref):
    # Grid: (i over batch tiles, j over OUT tiles, k over IN tiles); k innermost.
    k = pl.program_id(2)

    x = x_ref[...]                                   # [TB, TK]
    xs = x * eps_in_ref[...]                         # [TB, TK] * [1, TK]
    # mu path + sigma path with factorized noise, fused into one accumulator
    # update: y += x @ wmu + eps_out * ((x * eps_in) @ wsig)
    contrib = (jnp.dot(x, wmu_ref[...], preferred_element_type=jnp.float32)
               + eps_out_ref[...] * jnp.dot(xs, wsig_ref[...],
                                            preferred_element_type=jnp.float32))

    @pl.when(k == 0)
    def _():
        acc_ref[...] = contrib           # init from first dot (no zeros + add)

    @pl.when(k > 0)
    def _():
        acc_ref[...] += contrib

    @pl.when(k == pl.num_programs(2) - 1)
    def _():
        o_ref[...] = (acc_ref[...] + bias_ref[...]).astype(o_ref.dtype)


def _linear_kernel(x_ref, wmu_ref, bias_ref, o_ref, acc_ref):
    k = pl.program_id(2)

    contrib = jnp.dot(x_ref[...], wmu_ref[...], preferred_element_type=jnp.float32)

    @pl.when(k == 0)
    def _():
        acc_ref[...] = contrib

    @pl.when(k > 0)
    def _():
        acc_ref[...] += contrib

    @pl.when(k == pl.num_programs(2) - 1)
    def _():
        o_ref[...] = (acc_ref[...] + bias_ref[...]).astype(o_ref.dtype)


# ------------------------------- tiling ----------------------------------------

def _choose_out_in_tiles(in_features, out_features, max_tk, max_tn):
    IN128 = _round_up(in_features, 128)
    OUT128 = _round_up(out_features, 128)
    TK = min(IN128, max_tk)
    INp = _round_up(IN128, TK)
    TN = min(OUT128, max_tn)
    OUTp = _round_up(OUT128, TN)
    # v7x megacore: prefer >= 2 tiles along the (parallel) OUT axis when possible.
    if OUTp // TN == 1 and OUT128 >= 256:
        TN = _round_up(TN // 2, 128)
        OUTp = _round_up(OUT128, TN)
    return TN, TK, OUTp, INp


def _choose_batch_tile(B, n_j_tiles, max_tb):
    B8 = _round_up(B, 8)
    TB = min(B8, max_tb)          # TB >= B when it fits: weights stream once
    Bp = _round_up(B8, TB)
    # v7x megacore: if the OUT axis has a single tile and there is only one batch
    # tile, split the batch so both TensorCores get work (weights are small in
    # that regime, so the extra weight re-read is cheap).
    if n_j_tiles == 1 and Bp // TB == 1 and B8 >= 16:
        TB = _round_up(_cdiv(B8, 2), 8)
        Bp = _round_up(B8, TB)
    return TB, Bp


def _vmem_limit_bytes(TB, TN, TK, n_weight_mats):
    f32 = 4
    live = (2 * TB * TK                        # x tile, double-buffered
            + 2 * n_weight_mats * TK * TN      # weight tiles, double-buffered
            + 2 * TB * TN                      # output tile, double-buffered
            + TB * TN                          # f32 accumulator scratch
            + 2 * 4 * (TK + TN))               # row vectors (eps / bias), generous
    b = live * f32 * 3 // 2                    # headroom for compiler scratch
    # At least 32 MiB (v5e scoped default is 16 MiB), capped under v7x's 64 MiB.
    return int(min(max(b, 32 * 1024 * 1024), 56 * 1024 * 1024))


# ------------------------- parameter prep (once per reset_noise) ----------------

def prepare_noisy_linear(params, *, max_tk=2048, max_tn=512, max_tb=512):
    """One-time preparation (per init / reset_noise), NOT per forward:
    choose OUT/IN tiles, pad + pre-transpose the weights to [INp, OUTp] so the
    kernel runs the canonical [TB,TK] @ [TK,TN] matmul, and fold the bias noise.
    Per-forward only the activations are padded."""
    wmu = params["weight_mu"]
    OUT, IN = wmu.shape
    TN, TK, OUTp, INp = _choose_out_in_tiles(IN, OUT, max_tk, max_tn)
    pi, po = INp - IN, OUTp - OUT

    wmu_t = _pad2(wmu.T, pi, po)                               # [INp, OUTp]
    wsig_t = _pad2(params["weight_sigma"].T, pi, po)           # [INp, OUTp]
    eps_in_row = _pad2(params["eps_in"].reshape(1, IN), 0, pi)
    eps_out_row = _pad2(params["eps_out"].reshape(1, OUT), 0, po)
    bias_noisy = params["bias_mu"] + params["bias_sigma"] * params["bias_epsilon"]
    bias_noisy_row = _pad2(bias_noisy.reshape(1, OUT), 0, po)
    bias_mu_row = _pad2(params["bias_mu"].reshape(1, OUT), 0, po)

    return {
        "in_features": IN, "out_features": OUT,
        "INp": INp, "OUTp": OUTp, "TN": TN, "TK": TK, "max_tb": max_tb,
        "weight_mu_t": wmu_t, "weight_sigma_t": wsig_t,
        "eps_in_row": eps_in_row, "eps_out_row": eps_out_row,
        "bias_noisy_row": bias_noisy_row, "bias_mu_row": bias_mu_row,
    }


# ------------------------------- forward ----------------------------------------

def noisy_linear(x, prep, *, training=True):
    """Pallas forward for NoisyLinear.  x: [B, IN] float32, prep from
    prepare_noisy_linear()."""
    B, IN = x.shape
    assert IN == prep["in_features"], "input feature dim mismatch"
    OUT = prep["out_features"]
    INp, OUTp, TN, TK = prep["INp"], prep["OUTp"], prep["TN"], prep["TK"]
    n_j = OUTp // TN
    TB, Bp = _choose_batch_tile(B, n_j, prep["max_tb"])

    xp = _pad2(x, Bp - B, INp - IN)          # only the activations pad per call

    grid = (Bp // TB, n_j, INp // TK)

    x_spec = pl.BlockSpec((TB, TK), lambda i, j, k: (i, k))
    w_spec = pl.BlockSpec((TK, TN), lambda i, j, k: (k, j))
    rowK_spec = pl.BlockSpec((1, TK), lambda i, j, k: (0, k))
    rowN_spec = pl.BlockSpec((1, TN), lambda i, j, k: (0, j))
    out_spec = pl.BlockSpec((TB, TN), lambda i, j, k: (i, j))

    n_w = 2 if training else 1
    cparams = pltpu.CompilerParams(
        dimension_semantics=("parallel", "parallel", "arbitrary"),
        vmem_limit_bytes=_vmem_limit_bytes(TB, TN, TK, n_w))
    scratch = [pltpu.VMEM((TB, TN), jnp.float32)]

    if training:
        yp = pl.pallas_call(
            _noisy_linear_kernel,
            out_shape=jax.ShapeDtypeStruct((Bp, OUTp), x.dtype),
            grid_spec=pltpu.PrefetchScalarGridSpec(
                num_scalar_prefetch=0,
                grid=grid,
                in_specs=[x_spec, w_spec, w_spec, rowK_spec, rowN_spec, rowN_spec],
                out_specs=out_spec,
                scratch_shapes=scratch),
            compiler_params=cparams,
        )(xp, prep["weight_mu_t"], prep["weight_sigma_t"],
          prep["eps_in_row"], prep["eps_out_row"], prep["bias_noisy_row"])
    else:
        yp = pl.pallas_call(
            _linear_kernel,
            out_shape=jax.ShapeDtypeStruct((Bp, OUTp), x.dtype),
            grid_spec=pltpu.PrefetchScalarGridSpec(
                num_scalar_prefetch=0,
                grid=grid,
                in_specs=[x_spec, w_spec, rowN_spec],
                out_specs=out_spec,
                scratch_shapes=scratch),
            compiler_params=cparams,
        )(xp, prep["weight_mu_t"], prep["bias_mu_row"])

    return yp[:B, :OUT]


# ------------------------- Parameter / noise init --------------------------------

def _scale_noise(key, size):
    """Factorized Gaussian noise: sign(x) * sqrt(|x|) with x ~ N(0, 1)."""
    x = jax.random.normal(key, (size,), dtype=jnp.float32)
    return jnp.sign(x) * jnp.sqrt(jnp.abs(x))


def init_noisy_linear(key, in_features, out_features, std_init=0.5):
    """Re-implementation of reset_parameters() + reset_noise().
    Noise is generated host-side with jax.random (matching reset_noise()); the
    kernel consumes the noise factors eps_in/eps_out directly."""
    k_wmu, k_bmu, k_ein, k_eout = jax.random.split(key, 4)
    mu_range = 1.0 / np.sqrt(in_features)

    weight_mu = jax.random.uniform(
        k_wmu, (out_features, in_features), dtype=jnp.float32,
        minval=-mu_range, maxval=mu_range)
    bias_mu = jax.random.uniform(
        k_bmu, (out_features,), dtype=jnp.float32,
        minval=-mu_range, maxval=mu_range)
    weight_sigma = jnp.full((out_features, in_features),
                            std_init / np.sqrt(in_features), dtype=jnp.float32)
    bias_sigma = jnp.full((out_features,),
                          std_init / np.sqrt(out_features), dtype=jnp.float32)

    eps_in = _scale_noise(k_ein, in_features)     # [IN]
    eps_out = _scale_noise(k_eout, out_features)  # [OUT]

    return {
        "weight_mu": weight_mu,
        "weight_sigma": weight_sigma,
        "bias_mu": bias_mu,
        "bias_sigma": bias_sigma,
        # factorized noise (consumed by the kernel)
        "eps_in": eps_in,
        "eps_out": eps_out,
        "bias_epsilon": eps_out,
        # materialized noise (only for the pure-JAX reference check)
        "weight_epsilon": jnp.outer(eps_out, eps_in),
    }


# Pure-JAX reference matching the PyTorch forward (materialized noisy weight).
def _noisy_linear_ref(x, p, training=True):
    if training:
        w = p["weight_mu"] + p["weight_sigma"] * p["weight_epsilon"]
        b = p["bias_mu"] + p["bias_sigma"] * p["bias_epsilon"]
    else:
        w = p["weight_mu"]
        b = p["bias_mu"]
    return x @ w.T + b


# --------------------------------- Main ------------------------------------------

if __name__ == "__main__":
    key = jax.random.PRNGKey(0)

    cases = [
        # (B, IN, OUT, prepare overrides) — overrides exercise multi-tile grid
        # paths (multi-K accumulation, multi-i) at small shapes.
        (8, 32, 16, {}),
        (64, 1024, 384, {}),
        (48, 512, 128, dict(max_tk=128, max_tn=128, max_tb=16)),
    ]
    for (B, IN, OUT, kw) in cases:
        k_param, k_x, key = jax.random.split(key, 3)
        params = init_noisy_linear(k_param, IN, OUT, std_init=0.5)
        prep = prepare_noisy_linear(params, **kw)   # once per init / reset_noise
        x = jax.random.normal(k_x, (B, IN), dtype=jnp.float32)

        # Training-mode forward (noisy weights) through the Pallas kernel.
        y = jax.block_until_ready(noisy_linear(x, prep, training=True))
        # Eval-mode forward (lean linear kernel).
        y_eval = jax.block_until_ready(noisy_linear(x, prep, training=False))

        # Correctness vs pure-JAX reference.
        y_ref = _noisy_linear_ref(x, params, training=True)
        y_eval_ref = _noisy_linear_ref(x, params, training=False)
        np.testing.assert_allclose(np.asarray(y), np.asarray(y_ref),
                                   rtol=1e-4, atol=1e-5)
        np.testing.assert_allclose(np.asarray(y_eval), np.asarray(y_eval_ref),
                                   rtol=1e-4, atol=1e-5)

    print("KERNEL_OK")
</pallas_src>

<mosaic_0001>
module attributes {stable_mosaic.version = 11 : i64} {
  func.func @_noisy_linear_kernel(%arg0: i32, %arg1: i32, %arg2: i32, %arg3: memref<8x128xf32, #tpu.memory_space<vmem>>, %arg4: memref<128x128xf32, #tpu.memory_space<vmem>>, %arg5: memref<128x128xf32, #tpu.memory_space<vmem>>, %arg6: memref<1x128xf32, #tpu.memory_space<vmem>>, %arg7: memref<1x128xf32, #tpu.memory_space<vmem>>, %arg8: memref<1x128xf32, #tpu.memory_space<vmem>>, %arg9: memref<8x128xf32, #tpu.memory_space<vmem>>, %arg10: memref<8x128xf32, #tpu.memory_space<vmem>>) attributes {dimension_semantics = [#tpu.dimension_semantics<parallel>, #tpu.dimension_semantics<parallel>, #tpu.dimension_semantics<arbitrary>], iteration_bounds = array<i64: 1, 1, 1>, scalar_prefetch = 0 : i64, scratch_operands = 1 : i64, tpu.core_type = #tpu.core_type<tc>, window_params = [{transform_indices = @transform_0, window_bounds = array<i64: 8, 128>}, {transform_indices = @transform_1, window_bounds = array<i64: 128, 128>}, {transform_indices = @transform_2, window_bounds = array<i64: 128, 128>}, {transform_indices = @transform_3, window_bounds = array<i64: 1, 128>}, {transform_indices = @transform_4, window_bounds = array<i64: 1, 128>}, {transform_indices = @transform_5, window_bounds = array<i64: 1, 128>}, {transform_indices = @transform_6, window_bounds = array<i64: 8, 128>}]} {
    %c0 = arith.constant 0 : index
    %c0_0 = arith.constant 0 : index
    %0 = vector.load %arg3[%c0, %c0_0] : memref<8x128xf32, #tpu.memory_space<vmem>>, vector<8x128xf32>
    %c0_1 = arith.constant 0 : index
    %c0_2 = arith.constant 0 : index
    %1 = vector.load %arg6[%c0_1, %c0_2] : memref<1x128xf32, #tpu.memory_space<vmem>>, vector<1x128xf32>
    %2 = vector.broadcast %1 : vector<1x128xf32> to vector<8x128xf32>
    %3 = arith.mulf %0, %2 : vector<8x128xf32>
    %c0_3 = arith.constant 0 : index
    %c0_4 = arith.constant 0 : index
    %4 = vector.load %arg4[%c0_3, %c0_4] : memref<128x128xf32, #tpu.memory_space<vmem>>, vector<128x128xf32>
    %cst = arith.constant dense<0.000000e+00> : vector<8x128xf32>
    %5 = tpu.matmul %0, %4, %cst {dimension_numbers = #tpu.dot_dimension_numbers<[1], [0], [0], [1], [0, 0, 1, 1], [], []>} : vector<8x128xf32>, vector<128x128xf32>, vector<8x128xf32> -> vector<8x128xf32>
    %c0_5 = arith.constant 0 : index
    %c0_6 = arith.constant 0 : index
    %6 = vector.load %arg7[%c0_5, %c0_6] : memref<1x128xf32, #tpu.memory_space<vmem>>, vector<1x128xf32>
    %c0_7 = arith.constant 0 : index
    %c0_8 = arith.constant 0 : index
    %7 = vector.load %arg5[%c0_7, %c0_8] : memref<128x128xf32, #tpu.memory_space<vmem>>, vector<128x128xf32>
    %cst_9 = arith.constant dense<0.000000e+00> : vector<8x128xf32>
    %8 = tpu.matmul %3, %7, %cst_9 {dimension_numbers = #tpu.dot_dimension_numbers<[1], [0], [0], [1], [0, 0, 1, 1], [], []>} : vector<8x128xf32>, vector<128x128xf32>, vector<8x128xf32> -> vector<8x128xf32>
    %9 = vector.broadcast %6 : vector<1x128xf32> to vector<8x128xf32>
    %10 = arith.mulf %9, %8 : vector<8x128xf32>
    %11 = arith.addf %5, %10 : vector<8x128xf32>
    %c0_i32 = arith.constant 0 : i32
    %12 = arith.cmpi eq, %arg2, %c0_i32 : i32
    %13 = arith.extui %12 : i1 to i32
    %c0_i32_10 = arith.constant 0 : i32
    %14 = arith.cmpi ne, %13, %c0_i32_10 : i32
    scf.if %14 {
      %c0_15 = arith.constant 0 : index
      %c0_16 = arith.constant 0 : index
      %21 = vector.load %arg10[%c0_15, %c0_16] : memref<8x128xf32, #tpu.memory_space<vmem>>, vector<8x128xf32>
      tpu.vector_store %arg10[%c0_15, %c0_16], %11 {strides = array<i32>} : memref<8x128xf32, #tpu.memory_space<vmem>>, vector<8x128xf32>,
    } else {
    }
    %c0_i32_11 = arith.constant 0 : i32
    %15 = arith.cmpi sgt, %arg2, %c0_i32_11 : i32
    %16 = arith.extui %15 : i1 to i32
    %c0_i32_12 = arith.constant 0 : i32
    %17 = arith.cmpi ne, %16, %c0_i32_12 : i32
    scf.if %17 {
      %c0_15 = arith.constant 0 : index
      %c0_16 = arith.constant 0 : index
      %21 = vector.load %arg10[%c0_15, %c0_16] : memref<8x128xf32, #tpu.memory_space<vmem>>, vector<8x128xf32>
      %22 = arith.addf %21, %11 : vector<8x128xf32>
      %c0_17 = arith.constant 0 : index
      %c0_18 = arith.constant 0 : index
      %23 = vector.load %arg10[%c0_17, %c0_18] : memref<8x128xf32, #tpu.memory_space<vmem>>, vector<8x128xf32>
      tpu.vector_store %arg10[%c0_17, %c0_18], %22 {strides = array<i32>} : memref<8x128xf32, #tpu.memory_space<vmem>>, vector<8x128xf32>,
    } else {
    }
    %c0_i32_13 = arith.constant 0 : i32
    %18 = arith.cmpi eq, %arg2, %c0_i32_13 : i32
    %19 = arith.extui %18 : i1 to i32
    %c0_i32_14 = arith.constant 0 : i32
    %20 = arith.cmpi ne, %19, %c0_i32_14 : i32
    scf.if %20 {
      %c0_15 = arith.constant 0 : index
      %c0_16 = arith.constant 0 : index
      %21 = vector.load %arg10[%c0_15, %c0_16] : memref<8x128xf32, #tpu.memory_space<vmem>>, vector<8x128xf32>
      %c0_17 = arith.constant 0 : index
      %c0_18 = arith.constant 0 : index
      %22 = vector.load %arg8[%c0_17, %c0_18] : memref<1x128xf32, #tpu.memory_space<vmem>>, vector<1x128xf32>
      %23 = vector.broadcast %22 : vector<1x128xf32> to vector<8x128xf32>
      %24 = arith.addf %21, %23 : vector<8x128xf32>
      %c0_19 = arith.constant 0 : index
      %c0_20 = arith.constant 0 : index
      %25 = vector.load %arg9[%c0_19, %c0_20] : memref<8x128xf32, #tpu.memory_space<vmem>>, vector<8x128xf32>
      tpu.vector_store %arg9[%c0_19, %c0_20], %24 {strides = array<i32>} : memref<8x128xf32, #tpu.memory_space<vmem>>, vector<8x128xf32>,
    } else {
    }
    return
  }
  func.func @transform_0(%arg0: i32, %arg1: i32, %arg2: i32) -> (i32, i32) {
    %c0_i32 = arith.constant 0 : i32
    return %arg0, %arg2 : i32, i32
  }
  func.func @transform_1(%arg0: i32, %arg1: i32, %arg2: i32) -> (i32, i32) {
    %c0_i32 = arith.constant 0 : i32
    return %arg2, %arg1 : i32, i32
  }
  func.func @transform_2(%arg0: i32, %arg1: i32, %arg2: i32) -> (i32, i32) {
    %c0_i32 = arith.constant 0 : i32
    return %arg2, %arg1 : i32, i32
  }
  func.func @transform_3(%arg0: i32, %arg1: i32, %arg2: i32) -> (i32, i32) {
    %c0_i32 = arith.constant 0 : i32
    %c0_i32_0 = arith.constant 0 : i32
    return %c0_i32, %arg2 : i32, i32
  }
  func.func @transform_4(%arg0: i32, %arg1: i32, %arg2: i32) -> (i32, i32) {
    %c0_i32 = arith.constant 0 : i32
    %c0_i32_0 = arith.constant 0 : i32
    return %c0_i32, %arg1 : i32, i32
  }
  func.func @transform_5(%arg0: i32, %arg1: i32, %arg2: i32) -> (i32, i32) {
    %c0_i32 = arith.constant 0 : i32
    %c0_i32_0 = arith.constant 0 : i32
    return %c0_i32, %arg1 : i32, i32
  }
  func.func @transform_6(%arg0: i32, %arg1: i32, %arg2: i32) -> (i32, i32) {
    %c0_i32 = arith.constant 0 : i32
    return %arg0, %arg1 : i32, i32
  }
}

</mosaic_0001>

<bundles_post_ra>
// kernel: tpu_custom_call.1
= control target key start
LH: loop header
LB: loop body
LE: loop exit
PB: predicated region body
PF: predicated region fallthrough
CT: control target
= control target key end

     0   :  { %11 = vsyncpa [#allocation4], 0  ;;  %s674_s0 = inlined_call_operand.hbm [shape: f32[8,128], index: 0, kind: input, shape index: {}]   ;;  %s675_s1 = inlined_call_operand.hbm [shape: f32[128,128], index: 1, kind: input, shape index: {}]   ;;  %s676_s2 = inlined_call_operand.hbm [shape: f32[128,128], index: 2, kind: input, shape index: {}]   ;;  %s677_s3 = inlined_call_operand.vmem [shape: f32[1,128], index: 3, kind: input, shape index: {}]   ;;  %s678_s4 = inlined_call_operand.vmem [shape: f32[1,128], index: 4, kind: input, shape index: {}]   ;;  %s679_s5 = inlined_call_operand.vmem [shape: f32[1,128], index: 5, kind: input, shape index: {}]   ;;  %s680_s6 = inlined_call_operand.hbm [shape: f32[8,128], index: 6, kind: output, shape index: {}]  }
   0x1   :  { %12 = vsyncpa [#allocation7], 0 }
   0x2   :  { %13 = vsyncpa [#allocation5], 0  ;;  %s551_s21 = smov [#allocation6]   ;;  %s457_s25 = scalar_lea.hbm %s675_s1, 2048 }
   0x3   :  { %s29_s22 = sshll.u32 %s551_s21, 4  ;;  %p458_p0 = scmp.ne.s32.totalorder %s675_s1, %s457_s25  ;;  %s30_s22 = int_to_ptr.vmem [resolvable:$true] %s29_s22 }
   0x4   :  { %p461_p1 = scmp.lt.u32.totalorder %s457_s25, %s675_s1 }
   0x6   :  { %p463_p2 = pnand %p461_p1, %p458_p0 }
   0x8   :  { %466 = shalt.err (!%p463_p2)
}
   0x9   :  { %s467_s30 = scalar_lea.vmem %s30_s22, 2048  ;;  %p472_p4 = scmp.lt.s32.totalorder %s30_s22, %s30_s22 }
   0xa   :  { %p468_p3 = scmp.ne.s32.totalorder %s30_s22, %s467_s30  ;;  %p473_p5 = scmp.lt.s32.totalorder %s467_s30, %s467_s30 }
   0xc   :  { %p474_p6 = por %p473_p5, %p472_p4 }
   0xe   :  { %p475_p7 = pnand %p474_p6, %p468_p3 }
  0x10   :  { %478 = shalt.err (!%p475_p7)
}
  0x11   :  { %s552_s7 = smov 128   ;;  %s553_s8 = smov 8  }
  0x12   :  { %35 = dma.hbm_to_vmem [thread:$0]  %s675_s1, 2048, %s30_s22, [#allocation7], %s552_s7, %s552_s7, %s553_s8  }
  0x13   :  { %s554_s11 = smov [#allocation3]   ;;  %s555_s13 = smov [#allocation8]  }
  0x14   :  { %s20_s12 = sshll.u32 %s554_s11, 4  ;;  %s41_s14 = sshll.u32 %s555_s13, 4  ;;  %s21_s12 = int_to_ptr.vmem [resolvable:$true] %s20_s12  ;;  %s42_s14 = int_to_ptr.vmem [resolvable:$true] %s41_s14 }
  0x15   :  { %s479_s17 = scalar_lea.hbm %s674_s0, 128 }
  0x16   :  { %p480_p8 = scmp.ne.s32.totalorder %s674_s0, %s479_s17  ;;  %p483_p9 = scmp.lt.u32.totalorder %s479_s17, %s674_s0 }
  0x18   :  { %p485_p10 = pnand %p483_p9, %p480_p8 }
  0x1a   :  { %488 = shalt.err (!%p485_p10)
}
  0x1b   :  { %s489_s1 = scalar_lea.vmem %s21_s12, 128  ;;  %p494_p12 = scmp.lt.s32.totalorder %s21_s12, %s21_s12 }
  0x1c   :  { %p490_p11 = scmp.ne.s32.totalorder %s21_s12, %s489_s1  ;;  %p495_p13 = scmp.lt.s32.totalorder %s489_s1, %s489_s1 }
  0x1e   :  { %p496_p0 = por %p495_p13, %p494_p12 }
  0x20   :  { %p497_p1 = pnand %p496_p0, %p490_p11 }
  0x22   :  { %500 = shalt.err (!%p497_p1)
}
  0x23   :  { %23 = dma.hbm_to_vmem [thread:$0]  %s674_s0, 128, %s21_s12, [#allocation4]  }
  0x24   :  { %s501_s26 = scalar_lea.hbm %s676_s2, 2048 }
  0x25   :  { %p502_p2 = scmp.ne.s32.totalorder %s676_s2, %s501_s26  ;;  %p505_p3 = scmp.lt.u32.totalorder %s501_s26, %s676_s2 }
  0x27   :  { %p507_p4 = pnand %p505_p3, %p502_p2 }
  0x29   :  { %510 = shalt.err (!%p507_p4)
}
  0x2a   :  { %s511_s9 = scalar_lea.vmem %s42_s14, 2048  ;;  %p516_p6 = scmp.lt.s32.totalorder %s42_s14, %s42_s14 }
  0x2b   :  { %p512_p5 = scmp.ne.s32.totalorder %s42_s14, %s511_s9  ;;  %p517_p7 = scmp.lt.s32.totalorder %s511_s9, %s511_s9 }
  0x2d   :  { %p518_p8 = por %p517_p7, %p516_p6 }
  0x2f   :  { %p519_p9 = pnand %p518_p8, %p512_p5 }
  0x31   :  { %522 = shalt.err (!%p519_p9)
}
  0x32   :  { %47 = dma.hbm_to_vmem [thread:$0]  %s676_s2, 2048, %s42_s14, [#allocation7], %s552_s7, %s552_s7, %s553_s8  }
  0x33   :  { %545 = dma.done.wait [#allocation4], 128  }
  0x34   :  { %546 = vsyncadd [#allocation4], 4294967168 }
  0x35   :  { %547 = dma.done.wait [#allocation7], 4096  }
  0x36   :  { %548 = vsyncadd [#allocation7], 4294963200  ;;  %v556_v0 = vmov 0.0|0.0   ;;  %vm557_vm0 = vmmov 0   ;;  %v558_v1 = vmov 0.0   ;;  %v89_v2 = vld [vmem:[#allocation8] sm:$0xff] }
  0x37   :  { %400 = vmatprep.subr.bf16.mxu0 %v556_v0  ;;  %424 = vmatprep.subr.bf16.mxu1 %v556_v0  ;;  %v90_v3 = vld [vmem:[#allocation8 + $0x8] sm:$0xff]  ;;  %v72_v4 = vld [vmem:[#allocation6] sm:$0xff]  ;;  %v91_v7 = vld [vmem:[#allocation8 + $0x10] sm:$0xff]  ;;  %s559_s13 = smov [#allocation9]  }
  0x38   :  { %362 = vmatprep.mubr.msk.f32.mxu0 %vm557_vm0, %v558_v1  ;;  %397 = vmatprep.mubr.msk.f32.mxu1 %vm557_vm0, %v558_v1  ;;  %v401_v5 = vpack.c.bf16 %v90_v3, %v89_v2  ;;  %v73_v6 = vld [vmem:[#allocation6 + $0x8] sm:$0xff]  ;;  %v92_v8 = vld [vmem:[#allocation8 + $0x18] sm:$0xff]  ;;  %v74_v10 = vld [vmem:[#allocation6 + $0x10] sm:$0xff]  ;;  %s283_s14 = sshll.u32 %s559_s13, 4  ;;  %s284_s14 = int_to_ptr.vmem [resolvable:$true] %s283_s14 }
  0x39   :  { %v425_v9 = vpack.c.bf16 %v73_v6, %v72_v4  ;;  %v75_v11 = vld [vmem:[#allocation6 + $0x18] sm:$0xff]  ;;  %v404_v12 = vpack.c.bf16 %v92_v8, %v91_v7  ;;  %v93_v14 = vld [vmem:[#allocation8 + $0x20] sm:$0xff]  ;;  %v94_v15 = vld [vmem:[#allocation8 + $0x28] sm:$0xff]  ;;  %s523_s15 = scalar_lea.vmem %s284_s14, 128  ;;  %p528_p11 = scmp.lt.s32.totalorder %s284_s14, %s284_s14 }
  0x3a   :  { %402 = vmatpush3.bf16.msra.mxu0 %v401_v5  ;;  %v428_v13 = vpack.c.bf16 %v75_v11, %v74_v10  ;;  %v76_v16 = vld [vmem:[#allocation6 + $0x20] sm:$0xff]  ;;  %v77_v17 = vld [vmem:[#allocation6 + $0x28] sm:$0xff]  ;;  %v407_v18 = vpack.c.bf16 %v94_v15, %v93_v14  ;;  %v95_v20 = vld [vmem:[#allocation8 + $0x30] sm:$0xff]  ;;  %p524_p10 = scmp.ne.s32.totalorder %s284_s14, %s523_s15  ;;  %p529_p12 = scmp.lt.s32.totalorder %s523_s15, %s523_s15 }
  0x3b   :  { %426 = vmatpush3.bf16.msra.mxu1 %v425_v9  ;;  %403 = vmatprep.subr.bf16.mxu0 %v556_v0  ;;  %v431_v19 = vpack.c.bf16 %v77_v17, %v76_v16  ;;  %v96_v21 = vld [vmem:[#allocation8 + $0x38] sm:$0xff]  ;;  %v78_v22 = vld [vmem:[#allocation6 + $0x30] sm:$0xff]  ;;  %v97_v26 = vld [vmem:[#allocation8 + $0x40] sm:$0xff] }
  0x3c   :  { %427 = vmatprep.subr.bf16.mxu1 %v556_v0  ;;  %v79_v23 = vld [vmem:[#allocation6 + $0x38] sm:$0xff]  ;;  %v410_v24 = vpack.c.bf16 %v96_v21, %v95_v20  ;;  %v98_v27 = vld [vmem:[#allocation8 + $0x48] sm:$0xff]  ;;  %v80_v28 = vld [vmem:[#allocation6 + $0x40] sm:$0xff]  ;;  %p530_p13 = por %p529_p12, %p528_p11 }
  0x3d   :  { %v434_v25 = vpack.c.bf16 %v79_v23, %v78_v22  ;;  %v81_v29 = vld [vmem:[#allocation6 + $0x48] sm:$0xff]  ;;  %v413_v30 = vpack.c.bf16 %v98_v27, %v97_v26  ;;  %v99_v32 = vld [vmem:[#allocation8 + $0x50] sm:$0xff]  ;;  %v100_v33 = vld [vmem:[#allocation8 + $0x58] sm:$0xff] }
  0x3e   :  { %405 = vmatpush3.bf16.msra.mxu0 %v404_v12  ;;  %v437_v31 = vpack.c.bf16 %v81_v29, %v80_v28  ;;  %v82_v34 = vld [vmem:[#allocation6 + $0x50] sm:$0xff]  ;;  %v83_v35 = vld [vmem:[#allocation6 + $0x58] sm:$0xff]  ;;  %v416_v36 = vpack.c.bf16 %v100_v33, %v99_v32  ;;  %v101_v38 = vld [vmem:[#allocation8 + $0x60] sm:$0xff]  ;;  %p531_p0 = pnand %p530_p13, %p524_p10 }
  0x3f   :  { %429 = vmatpush3.bf16.msra.mxu1 %v428_v13  ;;  %406 = vmatprep.subr.bf16.mxu0 %v556_v0  ;;  %v440_v37 = vpack.c.bf16 %v83_v35, %v82_v34  ;;  %v102_v39 = vld [vmem:[#allocation8 + $0x68] sm:$0xff]  ;;  %v84_v40 = vld [vmem:[#allocation6 + $0x60] sm:$0xff]  ;;  %v103_v44 = vld [vmem:[#allocation8 + $0x70] sm:$0xff] }
  0x40   :  { %430 = vmatprep.subr.bf16.mxu1 %v556_v0  ;;  %v85_v41 = vld [vmem:[#allocation6 + $0x68] sm:$0xff]  ;;  %v419_v42 = vpack.c.bf16 %v102_v39, %v101_v38  ;;  %v104_v45 = vld [vmem:[#allocation8 + $0x78] sm:$0xff]  ;;  %v86_v46 = vld [vmem:[#allocation6 + $0x70] sm:$0xff] }
  0x41   :  { %v443_v43 = vpack.c.bf16 %v85_v41, %v84_v40  ;;  %v87_v47 = vld [vmem:[#allocation6 + $0x78] sm:$0xff]  ;;  %v422_v48 = vpack.c.bf16 %v104_v45, %v103_v44 }
  0x42   :  { %408 = vmatpush3.bf16.msra.mxu0 %v407_v18  ;;  %v63_v49 = vld [vmem:[#allocation3] sm:$0xff]  ;;  %v446_v51 = vpack.c.bf16 %v87_v47, %v86_v46 }
  0x43   :  { %432 = vmatpush3.bf16.msra.mxu1 %v431_v19  ;;  %409 = vmatprep.subr.bf16.mxu0 %v556_v0  ;;  %v293_v50 = vld [vmem:[%s677_s3] ss:$0 sm:$0xff] }
  0x44   :  { %433 = vmatprep.subr.bf16.mxu1 %v556_v0  ;;  %v71_v52 = vmul.f32 %v293_v50, %v63_v49  ;;  %v294_v53 = vld [vmem:[%s678_s4] ss:$0 sm:$0xff] }
  0x45   :  { %v295_v58 = vld [vmem:[%s679_s5] ss:$0 sm:$0xff] }
  0x46   :  { %411 = vmatpush3.bf16.msra.mxu0 %v410_v24 }
  0x47   :  { %435 = vmatpush3.bf16.msra.mxu1 %v434_v25  ;;  %412 = vmatprep.subr.bf16.mxu0 %v556_v0 }
  0x48   :  { %436 = vmatprep.subr.bf16.mxu1 %v556_v0 }
  0x4a   :  { %414 = vmatpush3.bf16.msra.mxu0 %v413_v30 }
  0x4b   :  { %438 = vmatpush3.bf16.msra.mxu1 %v437_v31  ;;  %415 = vmatprep.subr.bf16.mxu0 %v556_v0 }
  0x4c   :  { %439 = vmatprep.subr.bf16.mxu1 %v556_v0 }
  0x4e   :  { %417 = vmatpush3.bf16.msra.mxu0 %v416_v36 }
  0x4f   :  { %441 = vmatpush3.bf16.msra.mxu1 %v440_v37  ;;  %418 = vmatprep.subr.bf16.mxu0 %v556_v0 }
  0x50   :  { %442 = vmatprep.subr.bf16.mxu1 %v556_v0 }
  0x52   :  { %420 = vmatpush3.bf16.msra.mxu0 %v419_v42 }
  0x53   :  { %444 = vmatpush3.bf16.msra.mxu1 %v443_v43  ;;  %421 = vmatprep.subr.bf16.mxu0 %v556_v0 }
  0x54   :  { %445 = vmatprep.subr.bf16.mxu1 %v556_v0 }
  0x56   :  { %423 = vmatpush3.bf16.msra.mxu0 %v422_v48 }
  0x57   :  { %447 = vmatpush3.bf16.msra.mxu1 %v446_v51 }
  0x59   :  { %363 = vmatmul.mubr.f32.vlgmr.msra.gmra.mrb[0].mxu0 %v71_v52 }
  0x5a   :  { %398 = vmatmul.mubr.f32.vlgmr.msra.gmra.mrb[0].mxu1 %v63_v49 }
 0x12c   :  { %v171_v54 = vpop.f32.mrb[0].mxu0 }
 0x12d   :  { %v181_v55 = vmul.f32 %v294_v53, %v171_v54  ;;  %v364_v56 = vpop.f32.mrb[1].mxu0  ;;  %v248_v57 = vpop.f32.mrb[0].mxu1 }
 0x12e   :  { %v399_v59 = vpop.f32.mrb[1].mxu1 }
 0x12f   :  { %v249_v60 = vadd.f32 %v248_v57, %v181_v55 }
 0x131   :  { %v275_v61 = vadd.f32 %v295_v58, %v249_v60 }
 0x133   :  { %276 = vst [vmem:[#allocation9] sm:$0xff] %v275_v61 }
 0x134   :  { %534 = shalt.err (!%p531_p0)
}
 0x135   :  { %s535_s17 = scalar_lea.hbm %s680_s6, 128 }
 0x136   :  { %p536_p1 = scmp.ne.s32.totalorder %s680_s6, %s535_s17  ;;  %p539_p2 = scmp.lt.u32.totalorder %s535_s17, %s680_s6 }
 0x138   :  { %p541_p3 = pnand %p539_p2, %p536_p1 }
 0x13a   :  { %544 = shalt.err (!%p541_p3)
}
 0x13b   :  { %286 = dma.vmem_to_hbm [thread:$0]  %s284_s14, 128, %s680_s6, [#allocation5]  }
 0x13c   :  { %549 = dma.done.wait [#allocation5], 128  }
 0x13d   :  { %550 = vsyncadd [#allocation5], 4294967168 }
 0x13e   :  { %290 = vsyncpa [#allocation4], 1 }
 0x13f   :  { %291 = vsyncpa [#allocation7], 1 }
 0x140   :  { %292 = vsyncpa [#allocation5], 1 }

</bundles_post_ra>
